<compile_context>
chip_gen: v5e
topology: v5e:2x2
jax: 0.10.0
libtpu: 0.0.40
codegen_flags: <defaults>
</compile_context>

<pallas_src>
import jax
import jax.numpy as jnp
from jax.experimental import pallas as pl
from jax.experimental.pallas import tpu as pltpu

LANE = 128          # TPU lane width; all activations are padded to this
NEG_INF = -1e9      # bias value for padded softmax / log_softmax columns


# ---------------------------------------------------------------------------
# Kernel
# ---------------------------------------------------------------------------
# packed params layout (f32 [392, 384]):
#   rows   0:128 : fused "linear" block, three 128-lane panels
#                    cols   0:128  attn  W   (rows 0:H = We, H:2H = Wh)
#                    cols 128:256  comb  W   (rows 0:H = We, 2H:3H = Wa)
#                    cols 256:384  out   W   (rows 0:H)
#   rows 128:256 : GRU W_i fused  (rows 0:H; gate g in cols g*128 : g*128+H)
#   rows 256:384 : GRU W_h fused  (same column layout)
#   row  384     : attn bias   (cols 0:L real, L:128 = -1e9)
#   row  385     : combine bias
#   row  386     : GRU gi bias (r: b_ir+b_hr, z: b_iz+b_hz, n: b_in)
#   row  387     : GRU b_hn
#   row  388     : out bias    (cols 0:V real, V:128 = -1e9)
def attn_decoder_kernel(params_ref, enc_ref, cat1_ref, h_ref,
                        logp_ref, newh_ref, attnw_ref):
    f32 = jnp.float32
    cat1 = cat1_ref[...]        # [1,128] = [emb | h | 0 ...]
    h = h_ref[...]              # [1,128] = [h | 0 ...]

    # --- attention: softmax(Linear_attn(cat(embedded, hidden))) -------------
    attn_logits = (jnp.dot(cat1, params_ref[0:128, 0:128],
                           preferred_element_type=f32)
                   + params_ref[384:385, 0:128])           # pads carry -1e9
    m = jnp.max(attn_logits, axis=1, keepdims=True)
    e = jnp.exp(attn_logits - m)                           # pads underflow to 0
    denom = jnp.sum(e, axis=1, keepdims=True)
    attn_w = e * pl.reciprocal(denom, approx=True)         # [1,128]
    attnw_ref[...] = attn_w

    # --- attn_applied = attn_w @ encoder_outputs (lands in lanes 2H:3H) -----
    attn_applied = jnp.dot(attn_w, enc_ref[...], preferred_element_type=f32)

    # --- combine: relu(Linear_combine(cat(embedded, attn_applied))) ---------
    # cat1 holds emb in lanes 0:H; attn_applied occupies lanes 2H:3H; the
    # combine weight rows for the h lanes (H:2H) are zero, so a plain add
    # builds the concatenated operand with no lane shuffles.
    cat2 = cat1 + attn_applied
    x = jnp.maximum(
        jnp.dot(cat2, params_ref[0:128, 128:256], preferred_element_type=f32)
        + params_ref[385:386, 0:128],
        0.0)                                               # [1,128], pads = 0

    # --- GRU cell: 2 fused matmuls, gates in 128-lane-aligned chunks --------
    gi = (jnp.dot(x, params_ref[128:256, :], preferred_element_type=f32)
          + params_ref[386:387, :])                        # [1, 384]
    gh = jnp.dot(h, params_ref[256:384, :], preferred_element_type=f32)
    r = jax.nn.sigmoid(gi[:, 0:128] + gh[:, 0:128])
    z = jax.nn.sigmoid(gi[:, 128:256] + gh[:, 128:256])
    n = jnp.tanh(gi[:, 256:384]
                 + r * (gh[:, 256:384] + params_ref[387:388, 0:128]))
    h_new = (1.0 - z) * n + z * h                          # pads stay exactly 0
    newh_ref[...] = h_new

    # --- output = log_softmax(Linear_out(h_new)) ----------------------------
    logits = (jnp.dot(h_new, params_ref[0:128, 256:384],
                      preferred_element_type=f32)
              + params_ref[388:389, 0:128])                # pads carry -1e9
    lm = jnp.max(logits, axis=1, keepdims=True)
    lse = jnp.log(jnp.sum(jnp.exp(logits - lm), axis=1, keepdims=True)) + lm
    logp_ref[...] = logits - lse


# ---------------------------------------------------------------------------
# Parameters (logical layout, same as PyTorch but transposed) + offline packing
# ---------------------------------------------------------------------------
def make_params(key, hidden_size, output_size, max_length):
    """Deterministic synthetic parameters in the logical (transposed) layout."""
    H, V, L = hidden_size, output_size, max_length
    ks = jax.random.split(key, 12)
    f = jnp.float32

    def u(k, shape, fan_in):
        bound = 1.0 / jnp.sqrt(fan_in)
        return jax.random.uniform(k, shape, f, -bound, bound)

    params = {
        "embedding": jax.random.normal(ks[0], (V, H), f),
        # attn: Linear(2H -> L), split into embedded-half / hidden-half.
        "attn_we": u(ks[1], (H, L), 2 * H),
        "attn_wh": u(ks[2], (H, L), 2 * H),
        "attn_b": u(ks[3], (1, L), 2 * H),
        # attn_combine: Linear(2H -> H), split.
        "comb_we": u(ks[4], (H, H), 2 * H),
        "comb_wa": u(ks[5], (H, H), 2 * H),
        "comb_b": u(ks[6], (1, H), 2 * H),
        # out: Linear(H -> V).
        "out_w": u(ks[7], (H, V), H),
        "out_b": u(ks[8], (1, V), H),
    }
    gk = jax.random.split(ks[9], 12)
    for i, g in enumerate(("r", "z", "n")):
        params[f"w_i{g}"] = u(gk[4 * i + 0], (H, H), H)
        params[f"w_h{g}"] = u(gk[4 * i + 1], (H, H), H)
        params[f"b_i{g}"] = u(gk[4 * i + 2], (1, H), H)
        params[f"b_h{g}"] = u(gk[4 * i + 3], (1, H), H)
    return params


def pack_params(p, hidden_size, output_size, max_length):
    """Pack every weight/bias into one contiguous [392, 384] f32 array."""
    H, V, L = hidden_size, output_size, max_length
    assert 3 * H <= LANE and V <= LANE and L <= LANE
    f = jnp.float32
    buf = jnp.zeros((3 * LANE + 8, 3 * LANE), f)

    # fused linear block (rows 0:128): attn | combine | out panels
    buf = buf.at[0:H, 0:L].set(p["attn_we"])
    buf = buf.at[H:2 * H, 0:L].set(p["attn_wh"])
    buf = buf.at[0:H, LANE:LANE + H].set(p["comb_we"])
    buf = buf.at[2 * H:3 * H, LANE:LANE + H].set(p["comb_wa"])
    buf = buf.at[0:H, 2 * LANE:2 * LANE + V].set(p["out_w"])

    # GRU fused weights (rows 128:256 input side, 256:384 hidden side)
    for g, name in enumerate(("r", "z", "n")):
        buf = buf.at[LANE:LANE + H, g * LANE:g * LANE + H].set(p[f"w_i{name}"])
        buf = buf.at[2 * LANE:2 * LANE + H, g * LANE:g * LANE + H].set(p[f"w_h{name}"])

    # bias rows (384..388); padded softmax columns get NEG_INF
    r0 = 3 * LANE
    buf = buf.at[r0 + 0, 0:LANE].set(jnp.full((LANE,), NEG_INF, f))
    buf = buf.at[r0 + 0, 0:L].set(p["attn_b"][0])
    buf = buf.at[r0 + 1, 0:H].set(p["comb_b"][0])
    buf = buf.at[r0 + 2, 0:H].set(p["b_ir"][0] + p["b_hr"][0])
    buf = buf.at[r0 + 2, LANE:LANE + H].set(p["b_iz"][0] + p["b_hz"][0])
    buf = buf.at[r0 + 2, 2 * LANE:2 * LANE + H].set(p["b_in"][0])
    buf = buf.at[r0 + 3, 0:H].set(p["b_hn"][0])
    buf = buf.at[r0 + 4, 0:LANE].set(jnp.full((LANE,), NEG_INF, f))
    buf = buf.at[r0 + 4, 0:V].set(p["out_b"][0])
    return buf


# ---------------------------------------------------------------------------
# Wrapper (mirrors AttnDecoderRNN.forward)
# ---------------------------------------------------------------------------
def attn_decoder_forward(input_token, hidden, encoder_outputs, embedding, packed):
    """Returns (log_probs [1,V], new_hidden [1,1,H], attn_weights [1,L])."""
    H = hidden.shape[-1]
    L = encoder_outputs.shape[0]
    V = embedding.shape[0]
    f32 = jnp.float32

    # embedding gather + dropout-as-identity stay in plain JAX (tiny).
    emb = embedding[input_token.reshape(-1)[0]].astype(f32)        # [H]
    h = hidden[0, 0].astype(f32)                                   # [H]

    cat1 = jnp.zeros((1, LANE), f32).at[0, 0:H].set(emb).at[0, H:2 * H].set(h)
    h_pad = jnp.zeros((1, LANE), f32).at[0, 0:H].set(h)
    # encoder outputs placed in lanes 2H:3H so attn_applied lands where the
    # fused combine weight expects it.
    enc_pad = jnp.zeros((LANE, LANE), f32).at[0:L, 2 * H:3 * H].set(
        encoder_outputs.astype(f32))

    vmem = pl.BlockSpec(memory_space=pltpu.MemorySpace.VMEM)
    logp_p, newh_p, attnw_p = pl.pallas_call(
        attn_decoder_kernel,
        out_shape=(jax.ShapeDtypeStruct((1, LANE), f32),
                   jax.ShapeDtypeStruct((1, LANE), f32),
                   jax.ShapeDtypeStruct((1, LANE), f32)),
        in_specs=[vmem, vmem, vmem, vmem],
        out_specs=(vmem, vmem, vmem),
    )(packed, enc_pad, cat1, h_pad)

    return logp_p[:, 0:V], newh_p[None, :, 0:H], attnw_p[:, 0:L]


# ---------------------------------------------------------------------------
# Pure-JAX reference (unfused, mirrors the PyTorch module exactly)
# ---------------------------------------------------------------------------
def reference_forward(input_token, hidden, encoder_outputs, params):
    emb = params["embedding"][input_token.reshape(-1)[0]][None, :]
    h = hidden[0]
    attn_logits = emb @ params["attn_we"] + h @ params["attn_wh"] + params["attn_b"]
    attn_w = jax.nn.softmax(attn_logits, axis=1)
    attn_applied = attn_w @ encoder_outputs
    x = jnp.maximum(
        emb @ params["comb_we"] + attn_applied @ params["comb_wa"] + params["comb_b"], 0.0)
    r = jax.nn.sigmoid(x @ params["w_ir"] + params["b_ir"] + h @ params["w_hr"] + params["b_hr"])
    z = jax.nn.sigmoid(x @ params["w_iz"] + params["b_iz"] + h @ params["w_hz"] + params["b_hz"])
    n = jnp.tanh(x @ params["w_in"] + params["b_in"] + r * (h @ params["w_hn"] + params["b_hn"]))
    h_new = (1.0 - z) * n + z * h
    logits = h_new @ params["out_w"] + params["out_b"]
    return jax.nn.log_softmax(logits, axis=1), h_new[None, :, :], attn_w


if __name__ == "__main__":
    hidden_size = 32
    output_size = 40   # vocabulary size
    max_length = 10

    key = jax.random.PRNGKey(0)
    kp, kh, ke = jax.random.split(key, 3)
    params = make_params(kp, hidden_size, output_size, max_length)
    packed = pack_params(params, hidden_size, output_size, max_length)

    input_token = jnp.array([[3]], dtype=jnp.int32)                       # like torch [[SOS]]
    hidden = jax.random.normal(kh, (1, 1, hidden_size), jnp.float32)      # GRU hidden
    encoder_outputs = jax.random.normal(ke, (max_length, hidden_size), jnp.float32)

    logp, h_new, attn_w = attn_decoder_forward(
        input_token, hidden, encoder_outputs, params["embedding"], packed)
    jax.block_until_ready((logp, h_new, attn_w))

    ref_logp, ref_h, ref_w = reference_forward(input_token, hidden, encoder_outputs, params)
    assert logp.shape == (1, output_size)
    assert h_new.shape == (1, 1, hidden_size)
    assert attn_w.shape == (1, max_length)
    # tolerance slightly relaxed for the approx-reciprocal softmax normalization
    assert jnp.allclose(logp, ref_logp, atol=2e-3), float(jnp.max(jnp.abs(logp - ref_logp)))
    assert jnp.allclose(h_new, ref_h, atol=2e-3), float(jnp.max(jnp.abs(h_new - ref_h)))
    assert jnp.allclose(attn_w, ref_w, atol=2e-3), float(jnp.max(jnp.abs(attn_w - ref_w)))

    print("KERNEL_OK")
</pallas_src>

<mosaic_0001>
module attributes {stable_mosaic.version = 11 : i64} {
  func.func @attn_decoder_kernel(%arg0: memref<392x384xf32, #tpu.memory_space<vmem>>, %arg1: memref<128x128xf32, #tpu.memory_space<vmem>>, %arg2: memref<1x128xf32, #tpu.memory_space<vmem>>, %arg3: memref<1x128xf32, #tpu.memory_space<vmem>>, %arg4: memref<1x128xf32, #tpu.memory_space<vmem>>, %arg5: memref<1x128xf32, #tpu.memory_space<vmem>>, %arg6: memref<1x128xf32, #tpu.memory_space<vmem>>) attributes {dimension_semantics = [], scalar_prefetch = 0 : i64, scratch_operands = 0 : i64, tpu.core_type = #tpu.core_type<tc>} {
    %c0 = arith.constant 0 : index
    %c0_0 = arith.constant 0 : index
    %0 = vector.load %arg2[%c0, %c0_0] : memref<1x128xf32, #tpu.memory_space<vmem>>, vector<1x128xf32>
    %c0_1 = arith.constant 0 : index
    %c0_2 = arith.constant 0 : index
    %1 = vector.load %arg3[%c0_1, %c0_2] : memref<1x128xf32, #tpu.memory_space<vmem>>, vector<1x128xf32>
    %c0_3 = arith.constant 0 : index
    %c0_4 = arith.constant 0 : index
    %2 = vector.load %arg0[%c0_3, %c0_4] : memref<392x384xf32, #tpu.memory_space<vmem>>, vector<128x128xf32>
    %cst = arith.constant dense<0.000000e+00> : vector<1x128xf32>
    %3 = tpu.matmul %0, %2, %cst {dimension_numbers = #tpu.dot_dimension_numbers<[1], [0], [0], [1], [0, 0, 1, 1], [], []>} : vector<1x128xf32>, vector<128x128xf32>, vector<1x128xf32> -> vector<1x128xf32>
    %c384 = arith.constant 384 : index
    %c0_5 = arith.constant 0 : index
    %4 = vector.load %arg0[%c384, %c0_5] : memref<392x384xf32, #tpu.memory_space<vmem>>, vector<1x128xf32>
    %5 = arith.addf %3, %4 : vector<1x128xf32>
    %cst_6 = arith.constant dense<0xFF800000> : vector<1xf32>
    %6 = vector.multi_reduction <maximumf>, %5, %cst_6 [1] : vector<1x128xf32> to vector<1xf32>
    %7 = vector.shape_cast %6 : vector<1xf32> to vector<1x1xf32>
    %8 = vector.broadcast %7 : vector<1x1xf32> to vector<1x128xf32>
    %9 = arith.subf %5, %8 : vector<1x128xf32>
    %10 = math.exp %9 : vector<1x128xf32>
    %cst_7 = arith.constant dense<0.000000e+00> : vector<1xf32>
    %11 = vector.multi_reduction <add>, %10, %cst_7 [1] : vector<1x128xf32> to vector<1xf32>
    %12 = vector.shape_cast %11 : vector<1xf32> to vector<1x1xf32>
    %13 = tpu.reciprocal %12 {approx = true} : vector<1x1xf32> -> vector<1x1xf32>
    %14 = vector.broadcast %13 : vector<1x1xf32> to vector<1x128xf32>
    %15 = arith.mulf %10, %14 : vector<1x128xf32>
    %c0_8 = arith.constant 0 : index
    %c0_9 = arith.constant 0 : index
    %16 = vector.load %arg6[%c0_8, %c0_9] : memref<1x128xf32, #tpu.memory_space<vmem>>, vector<1x128xf32>
    tpu.vector_store %arg6[%c0_8, %c0_9], %15 {strides = array<i32>} : memref<1x128xf32, #tpu.memory_space<vmem>>, vector<1x128xf32>,
    %c0_10 = arith.constant 0 : index
    %c0_11 = arith.constant 0 : index
    %17 = vector.load %arg1[%c0_10, %c0_11] : memref<128x128xf32, #tpu.memory_space<vmem>>, vector<128x128xf32>
    %cst_12 = arith.constant dense<0.000000e+00> : vector<1x128xf32>
    %18 = tpu.matmul %15, %17, %cst_12 {dimension_numbers = #tpu.dot_dimension_numbers<[1], [0], [0], [1], [0, 0, 1, 1], [], []>} : vector<1x128xf32>, vector<128x128xf32>, vector<1x128xf32> -> vector<1x128xf32>
    %19 = arith.addf %0, %18 : vector<1x128xf32>
    %c0_13 = arith.constant 0 : index
    %c128 = arith.constant 128 : index
    %20 = vector.load %arg0[%c0_13, %c128] : memref<392x384xf32, #tpu.memory_space<vmem>>, vector<128x128xf32>
    %cst_14 = arith.constant dense<0.000000e+00> : vector<1x128xf32>
    %21 = tpu.matmul %19, %20, %cst_14 {dimension_numbers = #tpu.dot_dimension_numbers<[1], [0], [0], [1], [0, 0, 1, 1], [], []>} : vector<1x128xf32>, vector<128x128xf32>, vector<1x128xf32> -> vector<1x128xf32>
    %c385 = arith.constant 385 : index
    %c0_15 = arith.constant 0 : index
    %22 = vector.load %arg0[%c385, %c0_15] : memref<392x384xf32, #tpu.memory_space<vmem>>, vector<1x128xf32>
    %23 = arith.addf %21, %22 : vector<1x128xf32>
    %cst_16 = arith.constant 0.000000e+00 : f32
    %24 = vector.broadcast %cst_16 : f32 to vector<1x128xf32>
    %25 = arith.maximumf %23, %24 : vector<1x128xf32>
    %c128_17 = arith.constant 128 : index
    %c0_18 = arith.constant 0 : index
    %26 = vector.load %arg0[%c128_17, %c0_18] : memref<392x384xf32, #tpu.memory_space<vmem>>, vector<128x384xf32>
    %cst_19 = arith.constant dense<0.000000e+00> : vector<1x384xf32>
    %27 = tpu.matmul %25, %26, %cst_19 {dimension_numbers = #tpu.dot_dimension_numbers<[1], [0], [0], [1], [0, 0, 1, 1], [], []>} : vector<1x128xf32>, vector<128x384xf32>, vector<1x384xf32> -> vector<1x384xf32>
    %c386 = arith.constant 386 : index
    %c0_20 = arith.constant 0 : index
    %28 = vector.load %arg0[%c386, %c0_20] : memref<392x384xf32, #tpu.memory_space<vmem>>, vector<1x384xf32>
    %29 = arith.addf %27, %28 : vector<1x384xf32>
    %c256 = arith.constant 256 : index
    %c0_21 = arith.constant 0 : index
    %30 = vector.load %arg0[%c256, %c0_21] : memref<392x384xf32, #tpu.memory_space<vmem>>, vector<128x384xf32>
    %cst_22 = arith.constant dense<0.000000e+00> : vector<1x384xf32>
    %31 = tpu.matmul %1, %30, %cst_22 {dimension_numbers = #tpu.dot_dimension_numbers<[1], [0], [0], [1], [0, 0, 1, 1], [], []>} : vector<1x128xf32>, vector<128x384xf32>, vector<1x384xf32> -> vector<1x384xf32>
    %32 = vector.extract_strided_slice %29 {offsets = [0, 0], sizes = [1, 128], strides = [1, 1]} : vector<1x384xf32> to vector<1x128xf32>
    %33 = vector.extract_strided_slice %31 {offsets = [0, 0], sizes = [1, 128], strides = [1, 1]} : vector<1x384xf32> to vector<1x128xf32>
    %34 = arith.addf %32, %33 : vector<1x128xf32>
    %35 = arith.negf %34 : vector<1x128xf32>
    %36 = math.exp %35 : vector<1x128xf32>
    %cst_23 = arith.constant 1.000000e+00 : f32
    %37 = vector.broadcast %cst_23 : f32 to vector<1x128xf32>
    %38 = arith.addf %37, %36 : vector<1x128xf32>
    %39 = arith.divf %37, %38 : vector<1x128xf32>
    %40 = vector.extract_strided_slice %29 {offsets = [0, 128], sizes = [1, 128], strides = [1, 1]} : vector<1x384xf32> to vector<1x128xf32>
    %41 = vector.extract_strided_slice %31 {offsets = [0, 128], sizes = [1, 128], strides = [1, 1]} : vector<1x384xf32> to vector<1x128xf32>
    %42 = arith.addf %40, %41 : vector<1x128xf32>
    %43 = arith.negf %42 : vector<1x128xf32>
    %44 = math.exp %43 : vector<1x128xf32>
    %cst_24 = arith.constant 1.000000e+00 : f32
    %45 = vector.broadcast %cst_24 : f32 to vector<1x128xf32>
    %46 = arith.addf %45, %44 : vector<1x128xf32>
    %47 = arith.divf %45, %46 : vector<1x128xf32>
    %48 = vector.extract_strided_slice %29 {offsets = [0, 256], sizes = [1, 128], strides = [1, 1]} : vector<1x384xf32> to vector<1x128xf32>
    %49 = vector.extract_strided_slice %31 {offsets = [0, 256], sizes = [1, 128], strides = [1, 1]} : vector<1x384xf32> to vector<1x128xf32>
    %c387 = arith.constant 387 : index
    %c0_25 = arith.constant 0 : index
    %50 = vector.load %arg0[%c387, %c0_25] : memref<392x384xf32, #tpu.memory_space<vmem>>, vector<1x128xf32>
    %51 = arith.addf %49, %50 : vector<1x128xf32>
    %52 = arith.mulf %39, %51 : vector<1x128xf32>
    %53 = arith.addf %48, %52 : vector<1x128xf32>
    %54 = math.tanh %53 : vector<1x128xf32>
    %cst_26 = arith.constant 1.000000e+00 : f32
    %55 = vector.broadcast %cst_26 : f32 to vector<1x128xf32>
    %56 = arith.subf %55, %47 : vector<1x128xf32>
    %57 = arith.mulf %56, %54 : vector<1x128xf32>
    %58 = arith.mulf %47, %1 : vector<1x128xf32>
    %59 = arith.addf %57, %58 : vector<1x128xf32>
    %c0_27 = arith.constant 0 : index
    %c0_28 = arith.constant 0 : index
    %60 = vector.load %arg5[%c0_27, %c0_28] : memref<1x128xf32, #tpu.memory_space<vmem>>, vector<1x128xf32>
    tpu.vector_store %arg5[%c0_27, %c0_28], %59 {strides = array<i32>} : memref<1x128xf32, #tpu.memory_space<vmem>>, vector<1x128xf32>,
    %c0_29 = arith.constant 0 : index
    %c256_30 = arith.constant 256 : index
    %61 = vector.load %arg0[%c0_29, %c256_30] : memref<392x384xf32, #tpu.memory_space<vmem>>, vector<128x128xf32>
    %cst_31 = arith.constant dense<0.000000e+00> : vector<1x128xf32>
    %62 = tpu.matmul %59, %61, %cst_31 {dimension_numbers = #tpu.dot_dimension_numbers<[1], [0], [0], [1], [0, 0, 1, 1], [], []>} : vector<1x128xf32>, vector<128x128xf32>, vector<1x128xf32> -> vector<1x128xf32>
    %c388 = arith.constant 388 : index
    %c0_32 = arith.constant 0 : index
    %63 = vector.load %arg0[%c388, %c0_32] : memref<392x384xf32, #tpu.memory_space<vmem>>, vector<1x128xf32>
    %64 = arith.addf %62, %63 : vector<1x128xf32>
    %cst_33 = arith.constant dense<0xFF800000> : vector<1xf32>
    %65 = vector.multi_reduction <maximumf>, %64, %cst_33 [1] : vector<1x128xf32> to vector<1xf32>
    %66 = vector.shape_cast %65 : vector<1xf32> to vector<1x1xf32>
    %67 = vector.broadcast %66 : vector<1x1xf32> to vector<1x128xf32>
    %68 = arith.subf %64, %67 : vector<1x128xf32>
    %69 = math.exp %68 : vector<1x128xf32>
    %cst_34 = arith.constant dense<0.000000e+00> : vector<1xf32>
    %70 = vector.multi_reduction <add>, %69, %cst_34 [1] : vector<1x128xf32> to vector<1xf32>
    %71 = vector.shape_cast %70 : vector<1xf32> to vector<1x1xf32>
    %72 = math.log %71 : vector<1x1xf32>
    %73 = arith.addf %72, %66 : vector<1x1xf32>
    %74 = vector.broadcast %73 : vector<1x1xf32> to vector<1x128xf32>
    %75 = arith.subf %64, %74 : vector<1x128xf32>
    %c0_35 = arith.constant 0 : index
    %c0_36 = arith.constant 0 : index
    %76 = vector.load %arg4[%c0_35, %c0_36] : memref<1x128xf32, #tpu.memory_space<vmem>>, vector<1x128xf32>
    tpu.vector_store %arg4[%c0_35, %c0_36], %75 {strides = array<i32>} : memref<1x128xf32, #tpu.memory_space<vmem>>, vector<1x128xf32>,
    return
  }
}

</mosaic_0001>

<bundles_post_ra>
// kernel: tpu_custom_call.1
= control target key start
LH: loop header
LB: loop body
LE: loop exit
PB: predicated region body
PF: predicated region fallthrough
CT: control target
= control target key end

     0   :  { %12 = vsyncpa [#allocation3], 0  ;;  %s797_s0 = inlined_call_operand.hbm [shape: f32[392,384], index: 0, kind: input, shape index: {}]   ;;  %s798_s1 = inlined_call_operand.hbm [shape: f32[128,128], index: 1, kind: input, shape index: {}]   ;;  %s799_s2 = inlined_call_operand.vmem [shape: f32[1,128], index: 2, kind: input, shape index: {}]   ;;  %s800_s3 = inlined_call_operand.vmem [shape: f32[1,128], index: 3, kind: input, shape index: {}]   ;;  %s801_s4 = inlined_call_operand.hbm [shape: f32[1,128], index: 4, kind: output, shape index: {0}]   ;;  %s802_s5 = inlined_call_operand.hbm [shape: f32[1,128], index: 5, kind: output, shape index: {1}]   ;;  %s803_s6 = inlined_call_operand.hbm [shape: f32[1,128], index: 6, kind: output, shape index: {2}]  }
   0x1   :  { %13 = vsyncpa [#allocation6], 0 }
   0x2   :  { %14 = vsyncpa [#allocation4], 0 }
   0x3   :  { %15 = vsyncpa [#allocation9], 0  ;;  %s20_s23 = sshll.u32 %s797_s0, 4  ;;  %s713_s24 = smov [#allocation2]   ;;  %s21_s23 = int_to_ptr.hbm [resolvable:$true] %s20_s23 }
   0x4   :  { %s22_s25 = sshll.u32 %s713_s24, 4  ;;  %s33_s28 = sshll.u32 %s798_s1, 4  ;;  %s23_s25 = int_to_ptr.vmem [resolvable:$true] %s22_s25  ;;  %s34_s28 = int_to_ptr.hbm [resolvable:$true] %s33_s28 }
   0x5   :  { %s714_s29 = smov 384   ;;  %s715_s30 = smov 24  }
   0x6   :  { %28 = dma.hbm_to_vmem [thread:$0]  %s21_s23, 18816, %s23_s25, [#allocation3], %s714_s29, %s714_s29, %s715_s30  }
   0x7   :  { %s716_s7 = smov [#allocation5]   ;;  %s717_s9 = smov 128  }
   0x8   :  { %s35_s8 = sshll.u32 %s716_s7, 4  ;;  %s718_s10 = smov 8   ;;  %s36_s8 = int_to_ptr.vmem [resolvable:$true] %s35_s8 }
   0x9   :  { %41 = dma.hbm_to_vmem [thread:$0]  %s34_s28, 2048, %s36_s8, [#allocation6], %s717_s9, %s717_s9, %s718_s10  }
   0xa   :  { %705 = dma.done.wait [#allocation3], 18816  }
   0xb   :  { %706 = vsyncadd [#allocation3], 4294948480 }
   0xc   :  { %707 = dma.done.wait [#allocation6], 2048  }
   0xd   :  { %708 = vsyncadd [#allocation6], 4294965248  ;;  %v71_v0 = vld [vmem:[#allocation2 + $0x168] sm:$0xff]  ;;  %v70_v1 = vld [vmem:[#allocation2 + $0x150] sm:$0xff]  ;;  %vm93_vm0 = vcmask 1040384   ;;  %s525_s13 = sshll.u32 %s802_s5, 4  ;;  %s526_s13 = int_to_ptr.hbm [resolvable:$true] %s525_s13 }
   0xe   :  { %73 = vmatpush.msra.mxu0 %v71_v0  ;;  %v69_v2 = vld [vmem:[#allocation2 + $0x138] sm:$0xff]  ;;  %v68_v3 = vld [vmem:[#allocation2 + $0x120] sm:$0xff]  ;;  %v67_v4 = vld [vmem:[#allocation2 + $0x108] sm:$0xff]  ;;  %s719_s14 = smov [#allocation8]   ;;  %s720_s16 = smov [#allocation10]  }
   0xf   :  { %v66_v5 = vld [vmem:[#allocation2 + $0xf0] sm:$0xff]  ;;  %v65_v6 = vld [vmem:[#allocation2 + $0xd8] sm:$0xff]  ;;  %v64_v7 = vld [vmem:[#allocation2 + $0xc0] sm:$0xff]  ;;  %s523_s15 = sshll.u32 %s719_s14, 4  ;;  %s534_s17 = sshll.u32 %s720_s16, 4  ;;  %s524_s15 = int_to_ptr.vmem [resolvable:$true] %s523_s15  ;;  %s535_s17 = int_to_ptr.vmem [resolvable:$true] %s534_s17 }
  0x10   :  { %74 = vmatpush.msra.mxu0 %v70_v1  ;;  %v63_v8 = vld [vmem:[#allocation2 + $0xa8] sm:$0xff]  ;;  %v62_v9 = vld [vmem:[#allocation2 + $0x90] sm:$0xff]  ;;  %v61_v10 = vld [vmem:[#allocation2 + $0x78] sm:$0xff]  ;;  %s536_s20 = sshll.u32 %s803_s6, 4  ;;  %s721_s5 = smov [#allocation7]   ;;  %s537_s20 = int_to_ptr.hbm [resolvable:$true] %s536_s20 }
  0x11   :  { %v60_v11 = vld [vmem:[#allocation2 + $0x60] sm:$0xff]  ;;  %v59_v12 = vld [vmem:[#allocation2 + $0x48] sm:$0xff]  ;;  %v58_v13 = vld [vmem:[#allocation2 + $0x30] sm:$0xff]  ;;  %s512_s21 = sshll.u32 %s721_s5, 4  ;;  %s514_s24 = sshll.u32 %s801_s4, 4  ;;  %s513_s21 = int_to_ptr.vmem [resolvable:$true] %s512_s21  ;;  %s515_s24 = int_to_ptr.hbm [resolvable:$true] %s514_s24 }
  0x12   :  { %75 = vmatpush.msra.mxu0 %v69_v2  ;;  %v57_v14 = vld [vmem:[#allocation2 + $0x18] sm:$0xff]  ;;  %v56_v15 = vld [vmem:[#allocation2] sm:$0xff]  ;;  %v121_v21 = vld [vmem:[#allocation5 + $0x78] sm:$0xff] }
  0x13   :  { %v766_v16 = vld [vmem:[%s799_s2] sm:$0x1]  ;;  %v120_v22 = vld [vmem:[#allocation5 + $0x70] sm:$0xff]  ;;  %122 = vmatpush.msra.mxu1 %v121_v21  ;;  %v118_v24 = vld [vmem:[#allocation5 + $0x60] sm:$0xff] }
  0x14   :  { %76 = vmatpush.msra.mxu0 %v68_v3  ;;  %v72_v17 = vld [vmem:[#allocation2 + $0x480] ss:$0 sm:$0xff]  ;;  %v117_v25 = vld [vmem:[#allocation5 + $0x58] sm:$0xff]  ;;  %v116_v26 = vld [vmem:[#allocation5 + $0x50] sm:$0xff] }
  0x15   :  { %v119_v23 = vld [vmem:[#allocation5 + $0x68] sm:$0xff]  ;;  %123 = vmatpush.msra.mxu1 %v120_v22  ;;  %v114_v28 = vld [vmem:[#allocation5 + $0x40] sm:$0xff]  ;;  %v113_v29 = vld [vmem:[#allocation5 + $0x38] sm:$0xff] }
  0x16   :  { %77 = vmatpush.msra.mxu0 %v67_v4  ;;  %v115_v27 = vld [vmem:[#allocation5 + $0x48] sm:$0xff]  ;;  %v112_v30 = vld [vmem:[#allocation5 + $0x30] sm:$0xff]  ;;  %v110_v37 = vld [vmem:[#allocation5 + $0x20] sm:$0xff] }
  0x17   :  { %124 = vmatpush.msra.mxu1 %v119_v23  ;;  %v111_v31 = vld [vmem:[#allocation5 + $0x28] sm:$0xff]  ;;  %v109_v38 = vld [vmem:[#allocation5 + $0x18] sm:$0xff]  ;;  %v108_v39 = vld [vmem:[#allocation5 + $0x10] sm:$0xff] }
  0x18   :  { %78 = vmatpush.msra.mxu0 %v66_v5  ;;  %v107_v40 = vld [vmem:[#allocation5 + $0x8] sm:$0xff]  ;;  %v106_v41 = vld [vmem:[#allocation5] sm:$0xff]  ;;  %v158_v42 = vld [vmem:[#allocation2 + $0x170] sm:$0xff] }
  0x19   :  { %125 = vmatpush.msra.mxu1 %v118_v24  ;;  %v157_v43 = vld [vmem:[#allocation2 + $0x158] sm:$0xff]  ;;  %160 = vmatpush.msra.mxu2 %v158_v42  ;;  %v156_v44 = vld [vmem:[#allocation2 + $0x140] sm:$0xff]  ;;  %v155_v45 = vld [vmem:[#allocation2 + $0x128] sm:$0xff] }
  0x1a   :  { %79 = vmatpush.msra.mxu0 %v65_v6  ;;  %v154_v46 = vld [vmem:[#allocation2 + $0x110] sm:$0xff]  ;;  %v153_v47 = vld [vmem:[#allocation2 + $0xf8] sm:$0xff]  ;;  %v152_v48 = vld [vmem:[#allocation2 + $0xe0] sm:$0xff] }
  0x1b   :  { %126 = vmatpush.msra.mxu1 %v117_v25  ;;  %161 = vmatpush.msra.mxu2 %v157_v43  ;;  %v151_v49 = vld [vmem:[#allocation2 + $0xc8] sm:$0xff]  ;;  %v150_v50 = vld [vmem:[#allocation2 + $0xb0] sm:$0xff]  ;;  %v149_v51 = vld [vmem:[#allocation2 + $0x98] sm:$0xff] }
  0x1c   :  { %80 = vmatpush.msra.mxu0 %v64_v7  ;;  %v148_v52 = vld [vmem:[#allocation2 + $0x80] sm:$0xff]  ;;  %v147_v53 = vld [vmem:[#allocation2 + $0x68] sm:$0xff]  ;;  %v146_v55 = vld [vmem:[#allocation2 + $0x50] sm:$0xff] }
  0x1d   :  { %127 = vmatpush.msra.mxu1 %v116_v26  ;;  %162 = vmatpush.msra.mxu2 %v156_v44  ;;  %v145_v56 = vld [vmem:[#allocation2 + $0x38] sm:$0xff]  ;;  %v144_v59 = vld [vmem:[#allocation2 + $0x20] sm:$0xff]  ;;  %v143_v60 = vld [vmem:[#allocation2 + $0x8] sm:$0xff] }
  0x1e   :  { %81 = vmatpush.msra.mxu0 %v63_v8  ;;  %v226_v61 = vld [vmem:[#allocation2 + $0x2e8] sm:$0xff]  ;;  %v223_v62 = vld [vmem:[#allocation2 + $0x2d0] sm:$0xff]  ;;  %v220_v63 = vld [vmem:[#allocation2 + $0x2b8] sm:$0xff] }
  0x1f   :  { %128 = vmatpush.msra.mxu1 %v115_v27  ;;  %163 = vmatpush.msra.mxu2 %v155_v45  ;;  %v217_v0 = vld [vmem:[#allocation2 + $0x2a0] sm:$0xff]  ;;  %v227_v1 = vld [vmem:[#allocation2 + $0x2f0] sm:$0xff]  ;;  %v228_v2 = vld [vmem:[#allocation2 + $0x2f8] sm:$0xff] }
  0x20   :  { %82 = vmatpush.msra.mxu0 %v62_v9  ;;  %238 = vmatpush.msra.mxu3 %v226_v61  ;;  %v224_v3 = vld [vmem:[#allocation2 + $0x2d8] sm:$0xff]  ;;  %v225_v4 = vld [vmem:[#allocation2 + $0x2e0] sm:$0xff]  ;;  %v343_v5 = vld [vmem:[#allocation2 + $0x468] sm:$0xff] }
  0x21   :  { %129 = vmatpush.msra.mxu1 %v114_v28  ;;  %164 = vmatpush.msra.mxu2 %v154_v46  ;;  %v214_v6 = vld [vmem:[#allocation2 + $0x288] sm:$0xff]  ;;  %v221_v7 = vld [vmem:[#allocation2 + $0x2c0] sm:$0xff]  ;;  %v340_v9 = vld [vmem:[#allocation2 + $0x450] sm:$0xff] }
  0x22   :  { %83 = vmatpush.msra.mxu0 %v61_v10  ;;  %239 = vmatpush.msra.mxu3 %v223_v62  ;;  %v222_v8 = vld [vmem:[#allocation2 + $0x2c8] sm:$0xff]  ;;  %v211_v10 = vld [vmem:[#allocation2 + $0x270] sm:$0xff]  ;;  %v212_v21 = vld [vmem:[#allocation2 + $0x278] sm:$0xff] }
  0x23   :  { %130 = vmatpush.msra.mxu1 %v113_v29  ;;  %165 = vmatpush.msra.mxu2 %v153_v47  ;;  %v213_v22 = vld [vmem:[#allocation2 + $0x280] sm:$0xff]  ;;  %v328_v23 = vld [vmem:[#allocation2 + $0x3f0] sm:$0xff]  ;;  %v202_v24 = vld [vmem:[#allocation2 + $0x228] sm:$0xff] }
  0x24   :  { %84 = vmatpush.msra.mxu0 %v60_v11  ;;  %240 = vmatpush.msra.mxu3 %v220_v63  ;;  %v218_v11 = vld [vmem:[#allocation2 + $0x2a8] sm:$0xff]  ;;  %v209_v25 = vld [vmem:[#allocation2 + $0x260] sm:$0xff]  ;;  %v325_v27 = vld [vmem:[#allocation2 + $0x3d8] sm:$0xff] }
  0x25   :  { %131 = vmatpush.msra.mxu1 %v112_v30  ;;  %166 = vmatpush.msra.mxu2 %v152_v48  ;;  %v210_v26 = vld [vmem:[#allocation2 + $0x268] sm:$0xff]  ;;  %v199_v28 = vld [vmem:[#allocation2 + $0x210] sm:$0xff]  ;;  %v313_v43 = vld [vmem:[#allocation2 + $0x378] sm:$0xff] }
  0x26   :  { %85 = vmatpush.msra.mxu0 %v59_v12  ;;  %241 = vmatpush.msra.mxu3 %v217_v0  ;;  %v337_v12 = vld [vmem:[#allocation2 + $0x438] sm:$0xff]  ;;  %v206_v29 = vld [vmem:[#allocation2 + $0x248] sm:$0xff]  ;;  %v207_v30 = vld [vmem:[#allocation2 + $0x250] sm:$0xff] }
  0x27   :  { %132 = vmatpush.msra.mxu1 %v111_v31  ;;  %167 = vmatpush.msra.mxu2 %v151_v49  ;;  %v322_v31 = vld [vmem:[#allocation2 + $0x3c0] sm:$0xff]  ;;  %v198_v42 = vld [vmem:[#allocation2 + $0x208] sm:$0xff]  ;;  %v187_v44 = vld [vmem:[#allocation2 + $0x1b0] sm:$0xff] }
  0x28   :  { %86 = vmatpush.msra.mxu0 %v58_v13  ;;  %242 = vmatpush.msra.mxu3 %v214_v6  ;;  %v219_v13 = vld [vmem:[#allocation2 + $0x2b0] sm:$0xff]  ;;  %v194_v45 = vld [vmem:[#allocation2 + $0x1e8] sm:$0xff]  ;;  %v310_v47 = vld [vmem:[#allocation2 + $0x360] sm:$0xff] }
  0x29   :  { %133 = vmatpush.msra.mxu1 %v110_v37  ;;  %168 = vmatpush.msra.mxu2 %v150_v50  ;;  %v200_v37 = vld [vmem:[#allocation2 + $0x218] sm:$0xff]  ;;  %v195_v46 = vld [vmem:[#allocation2 + $0x1f0] sm:$0xff]  ;;  %v323_v61 = vld [vmem:[#allocation2 + $0x3c8] sm:$0xff] }
  0x2a   :  { %87 = vmatpush.msra.mxu0 %v57_v14  ;;  %v334_v14 = vld [vmem:[#allocation2 + $0x420] sm:$0xff]  ;;  %243 = vmatpush.msra.mxu3 %v211_v10  ;;  %v184_v48 = vld [vmem:[#allocation2 + $0x198] sm:$0xff]  ;;  %v191_v49 = vld [vmem:[#allocation2 + $0x1d0] sm:$0xff] }
  0x2b   :  { %134 = vmatpush.msra.mxu1 %v109_v38  ;;  %169 = vmatpush.msra.mxu2 %v149_v51  ;;  %v201_v38 = vld [vmem:[#allocation2 + $0x220] sm:$0xff]  ;;  %v192_v50 = vld [vmem:[#allocation2 + $0x1d8] sm:$0xff]  ;;  %v320_v62 = vld [vmem:[#allocation2 + $0x3b0] sm:$0xff] }
  0x2c   :  { %88 = vmatpush.msra.mxu0 %v56_v15  ;;  %v208_v15 = vld [vmem:[#allocation2 + $0x258] sm:$0xff]  ;;  %v181_v51 = vld [vmem:[#allocation2 + $0x180] sm:$0xff]  ;;  %v307_v0 = vld [vmem:[#allocation2 + $0x348] sm:$0xff] }
  0x2d   :  { %89 = vmatmul.f32.vlgmr.msra.gmra.mxu0 %v766_v16  ;;  %135 = vmatpush.msra.mxu1 %v108_v39  ;;  %v316_v39 = vld [vmem:[#allocation2 + $0x390] sm:$0xff]  ;;  %v189_v63 = vld [vmem:[#allocation2 + $0x1c0] sm:$0xff]  ;;  %v182_v6 = vld [vmem:[#allocation2 + $0x188] sm:$0xff] }
  0x2e   :  { %170 = vmatpush.msra.mxu2 %v148_v52  ;;  %258 = vmatpush.msrb.mxu0 %v227_v1  ;;  %v317_v1 = vld [vmem:[#allocation2 + $0x398] sm:$0xff]  ;;  %v298_v10 = vld [vmem:[#allocation2 + $0x300] sm:$0xff] }
  0x2f   :  { %136 = vmatpush.msra.mxu1 %v107_v40  ;;  %244 = vmatpush.msra.mxu3 %v208_v15  ;;  %v190_v40 = vld [vmem:[#allocation2 + $0x1c8] sm:$0xff]  ;;  %v302_v15 = vld [vmem:[#allocation2 + $0x320] sm:$0xff] }
  0x30   :  { %171 = vmatpush.msra.mxu2 %v147_v53  ;;  %259 = vmatpush.msrb.mxu0 %v224_v3  ;;  %v344_v53 = vld [vmem:[#allocation2 + $0x470] sm:$0xff]  ;;  %v186_v3 = vld [vmem:[#allocation2 + $0x1a8] sm:$0xff] }
  0x31   :  { %137 = vmatpush.msra.mxu1 %v106_v41  ;;  %v197_v41 = vld [vmem:[#allocation2 + $0x200] sm:$0xff] }
  0x32   :  { %172 = vmatpush.msra.mxu2 %v146_v55  ;;  %260 = vmatpush.msrb.mxu0 %v221_v7  ;;  %v341_v55 = vld [vmem:[#allocation2 + $0x458] sm:$0xff]  ;;  %v183_v7 = vld [vmem:[#allocation2 + $0x190] sm:$0xff] }
  0x33   :  { %278 = vmatpush.msrb.mxu1 %v228_v2  ;;  %v185_v2 = vld [vmem:[#allocation2 + $0x1a0] sm:$0xff] }
  0x34   :  { %173 = vmatpush.msra.mxu2 %v145_v56  ;;  %261 = vmatpush.msrb.mxu0 %v218_v11  ;;  %v338_v56 = vld [vmem:[#allocation2 + $0x440] sm:$0xff]  ;;  %v308_v11 = vld [vmem:[#allocation2 + $0x350] sm:$0xff] }
  0x35   :  { %279 = vmatpush.msrb.mxu1 %v225_v4  ;;  %v304_v4 = vld [vmem:[#allocation2 + $0x330] sm:$0xff] }
  0x36   :  { %174 = vmatpush.msra.mxu2 %v144_v59  ;;  %v329_v59 = vld [vmem:[#allocation2 + $0x3f8] sm:$0xff] }
  0x37   :  { %280 = vmatpush.msrb.mxu1 %v222_v8  ;;  %v301_v8 = vld [vmem:[#allocation2 + $0x318] sm:$0xff] }
  0x38   :  { %175 = vmatpush.msra.mxu2 %v143_v60  ;;  %v326_v60 = vld [vmem:[#allocation2 + $0x3e0] sm:$0xff] }
  0x39   :  { %281 = vmatpush.msrb.mxu1 %v219_v13  ;;  %v305_v13 = vld [vmem:[#allocation2 + $0x338] sm:$0xff] }
  0x3a   :  { %346 = vmatpush.msrb.mxu2 %v343_v5  ;;  %v314_v5 = vld [vmem:[#allocation2 + $0x380] sm:$0xff] }
  0x3c   :  { %347 = vmatpush.msrb.mxu2 %v340_v9  ;;  %v311_v9 = vld [vmem:[#allocation2 + $0x368] sm:$0xff] }
  0x3e   :  { %348 = vmatpush.msrb.mxu2 %v337_v12  ;;  %v775_v12 = vld [vmem:[%s800_s3] sm:$0x1] }
  0x40   :  { %349 = vmatpush.msrb.mxu2 %v334_v14  ;;  %v345_v14 = vld [vmem:[#allocation2 + $0x478] sm:$0xff] }
  0xaa   :  { %v90_v18 = vpop.f32.mrf.mxu0 }
  0xab   :  { %v91_v19 = vadd.f32 %v90_v18, %v72_v17  ;;  %v215_v17 = vld [vmem:[#allocation2 + $0x290] sm:$0xff]  ;;  %v216_v18 = vld [vmem:[#allocation2 + $0x298] sm:$0xff] }
  0xac   :  { %262 = vmatpush.msrb.mxu0 %v215_v17  ;;  %282 = vmatpush.msrb.mxu1 %v216_v18  ;;  %v342_v17 = vld [vmem:[#allocation2 + $0x460] sm:$0xff]  ;;  %v299_v18 = vld [vmem:[#allocation2 + $0x308] sm:$0xff] }
  0xad   :  { %v94_v20 = vsel %vm93_vm0, %v91_v19, -inf }
  0xae   :  { %95 = vmax.xlane.f32.xlu0 %v94_v20  ;;  %v205_v20 = vld [vmem:[#allocation2 + $0x240] sm:$0xff]  ;;  %263 = vmatpush.msrb.mxu0 %v212_v21  ;;  %v333_v21 = vld [vmem:[#allocation2 + $0x418] sm:$0xff] }
  0xaf   :  { %245 = vmatpush.msra.mxu3 %v205_v20  ;;  %283 = vmatpush.msrb.mxu1 %v213_v22  ;;  %v336_v20 = vld [vmem:[#allocation2 + $0x430] sm:$0xff]  ;;  %v330_v22 = vld [vmem:[#allocation2 + $0x400] sm:$0xff] }
  0xb0   :  { %264 = vmatpush.msrb.mxu0 %v209_v25  ;;  %v321_v25 = vld [vmem:[#allocation2 + $0x3b8] sm:$0xff] }
  0xb1   :  { %246 = vmatpush.msra.mxu3 %v202_v24  ;;  %284 = vmatpush.msrb.mxu1 %v210_v26  ;;  %v324_v24 = vld [vmem:[#allocation2 + $0x3d0] sm:$0xff]  ;;  %v318_v26 = vld [vmem:[#allocation2 + $0x3a0] sm:$0xff] }
  0xb2   :  { %265 = vmatpush.msrb.mxu0 %v206_v29  ;;  %v159_v29 = vld [vmem:[#allocation2 + $0x481] ss:$0 sm:$0xff] }
  0xb3   :  { %247 = vmatpush.msra.mxu3 %v199_v28  ;;  %285 = vmatpush.msrb.mxu1 %v207_v30  ;;  %v312_v28 = vld [vmem:[#allocation2 + $0x370] sm:$0xff]  ;;  %v309_v30 = vld [vmem:[#allocation2 + $0x358] sm:$0xff] }
 0x121   :  { %v96_v32 = vpop.xlane.xlu0 %95 }
 0x122   :  { %v97_v33 = vsub.f32 %v91_v19, %v96_v32  ;;  %v331_v19 = vld [vmem:[#allocation2 + $0x408] sm:$0xff]  ;;  %v196_v32 = vld [vmem:[#allocation2 + $0x1f8] sm:$0xff] }
 0x123   :  { %350 = vmatpush.msrb.mxu2 %v331_v19  ;;  %248 = vmatpush.msra.mxu3 %v196_v32  ;;  %v339_v19 = vld [vmem:[#allocation2 + $0x448] sm:$0xff] }
 0x124   :  { %v98_v34 = vmul.f32 1.442695, %v97_v33  ;;  %v203_v33 = vld [vmem:[#allocation2 + $0x230] sm:$0xff] }
 0x125   :  { %351 = vmatpush.msrb.mxu2 %v328_v23  ;;  %266 = vmatpush.msrb.mxu0 %v203_v33  ;;  %v327_v23 = vld [vmem:[#allocation2 + $0x3e8] sm:$0xff]  ;;  %v306_v33 = vld [vmem:[#allocation2 + $0x340] sm:$0xff] }
 0x126   :  { %567 = vpow2.f32 %v98_v34  ;;  %v204_v34 = vld [vmem:[#allocation2 + $0x238] sm:$0xff] }
 0x127   :  { %352 = vmatpush.msrb.mxu2 %v325_v27  ;;  %286 = vmatpush.msrb.mxu1 %v204_v34  ;;  %v315_v27 = vld [vmem:[#allocation2 + $0x388] sm:$0xff] }
 0x128   :  { %267 = vmatpush.msrb.mxu0 %v200_v37  ;;  %v471_v37 = vld [vmem:[#allocation2 + $0x178] sm:$0xff] }
 0x129   :  { %353 = vmatpush.msrb.mxu2 %v322_v31  ;;  %287 = vmatpush.msrb.mxu1 %v201_v38  ;;  %v470_v38 = vld [vmem:[#allocation2 + $0x160] sm:$0xff] }
 0x12a   :  { %268 = vmatpush.msrb.mxu0 %v197_v41  ;;  %v467_v41 = vld [vmem:[#allocation2 + $0x118] sm:$0xff] }
 0x12b   :  { %288 = vmatpush.msrb.mxu1 %v198_v42  ;;  %v466_v42 = vld [vmem:[#allocation2 + $0x100] sm:$0xff] }
 0x12c   :  { %v568_v35 = vpop.eup %567  ;;  %269 = vmatpush.msrb.mxu0 %v194_v45  ;;  %v465_v45 = vld [vmem:[#allocation2 + $0xe8] sm:$0xff] }
 0x12d   :  { %v100_v36 = vsel %vm93_vm0, %v568_v35, 0.0  ;;  %289 = vmatpush.msrb.mxu1 %v195_v46  ;;  %v464_v46 = vld [vmem:[#allocation2 + $0xd0] sm:$0xff] }
 0x12e   :  { %101 = vadd.xlane.f32.xlu0 %v100_v36  ;;  %v193_v36 = vld [vmem:[#allocation2 + $0x1e0] sm:$0xff]  ;;  %270 = vmatpush.msrb.mxu0 %v191_v49 }
 0x12f   :  { %249 = vmatpush.msra.mxu3 %v193_v36  ;;  %290 = vmatpush.msrb.mxu1 %v192_v50  ;;  %v300_v36 = vld [vmem:[#allocation2 + $0x310] sm:$0xff]  ;;  %v463_v50 = vld [vmem:[#allocation2 + $0xb8] sm:$0xff] }
 0x131   :  { %250 = vmatpush.msra.mxu3 %v190_v40  ;;  %291 = vmatpush.msrb.mxu1 %v189_v63  ;;  %v468_v40 = vld [vmem:[#allocation2 + $0x130] sm:$0xff]  ;;  %v457_v63 = vld [vmem:[#allocation2 + $0x28] sm:$0xff] }
 0x133   :  { %251 = vmatpush.msra.mxu3 %v187_v44  ;;  %292 = vmatpush.msrb.mxu1 %v186_v3 }
 0x135   :  { %252 = vmatpush.msra.mxu3 %v184_v48  ;;  %293 = vmatpush.msrb.mxu1 %v183_v7 }
 0x137   :  { %253 = vmatpush.msra.mxu3 %v181_v51 }
 0x139   :  { %366 = vmatpush.msrb.mxu3 %v344_v53  ;;  %v462_v53 = vld [vmem:[#allocation2 + $0xa0] sm:$0xff] }
 0x13b   :  { %367 = vmatpush.msrb.mxu3 %v341_v55 }
 0x13d   :  { %368 = vmatpush.msrb.mxu3 %v338_v56  ;;  %v461_v56 = vld [vmem:[#allocation2 + $0x88] sm:$0xff] }
 0x1a1   :  { %v102_v54 = vpop.xlane.xlu0 %101 }
 0x1a2   :  { %569 = vrcp.f32 %v102_v54 }
 0x1a8   :  { %v570_v57 = vpop.eup %569 }
 0x1a9   :  { %v104_v58 = vmul.f32 %v570_v57, %v568_v35  ;;  %v319_v35 = vld [vmem:[#allocation2 + $0x3a8] sm:$0xff] }
 0x1aa   :  { %354 = vmatpush.msrb.mxu2 %v319_v35  ;;  %v335_v57 = vld [vmem:[#allocation2 + $0x428] sm:$0xff] }
 0x1ab   :  { %105 = vst [vmem:[#allocation10] sm:$0x1] %v104_v58  ;;  %138 = vmatmul.f32.vlgmr.msra.gmra.mxu1 %v104_v58  ;;  %v332_v58 = vld [vmem:[#allocation2 + $0x410] sm:$0xff]  ;;  %369 = vmatpush.msrb.mxu3 %v335_v57  ;;  %v303_v35 = vld [vmem:[#allocation2 + $0x328] sm:$0xff] }
 0x1ac   :  { %355 = vmatpush.msrb.mxu2 %v316_v39  ;;  %473 = vmatpush.msra.mxu1 %v471_v37  ;;  %v469_v39 = vld [vmem:[#allocation2 + $0x148] sm:$0xff]  ;;  %v460_v57 = vld [vmem:[#allocation2 + $0x70] sm:$0xff] }
 0x1ad   :  { %370 = vmatpush.msrb.mxu3 %v332_v58 }
 0x1ae   :  { %356 = vmatpush.msrb.mxu2 %v313_v43  ;;  %474 = vmatpush.msra.mxu1 %v470_v38  ;;  %v780_v43 = vld [vmem:[#allocation2 + $0x482] ss:$8 sm:$0x7] }
 0x1af   :  { %371 = vmatpush.msrb.mxu3 %v329_v59  ;;  %v232_v44 = vperm.slane %v780_v43, 0  ;;  %v233_v51 = vperm.slane %v780_v43, 1  ;;  %v459_v59 = vld [vmem:[#allocation2 + $0x58] sm:$0xff] }
 0x1b0   :  { %357 = vmatpush.msrb.mxu2 %v310_v47  ;;  %475 = vmatpush.msra.mxu1 %v469_v39 }
 0x1b1   :  { %372 = vmatpush.msrb.mxu3 %v326_v60 }
 0x1b2   :  { %358 = vmatpush.msrb.mxu2 %v307_v0  ;;  %476 = vmatpush.msra.mxu1 %v468_v40  ;;  %v472_v40 = vld [vmem:[#allocation2 + $0x484] ss:$0 sm:$0xff] }
 0x1b3   :  { %373 = vmatpush.msrb.mxu3 %v323_v61 }
 0x1b4   :  { %359 = vmatpush.msrb.mxu2 %v304_v4  ;;  %477 = vmatpush.msra.mxu1 %v467_v41 }
 0x1b5   :  { %374 = vmatpush.msrb.mxu3 %v320_v62  ;;  %v458_v62 = vld [vmem:[#allocation2 + $0x40] sm:$0xff] }
 0x1b6   :  { %360 = vmatpush.msrb.mxu2 %v301_v8  ;;  %478 = vmatpush.msra.mxu1 %v466_v42 }
 0x1b7   :  { %375 = vmatpush.msrb.mxu3 %v317_v1  ;;  %v456_v1 = vld [vmem:[#allocation2 + $0x10] sm:$0xff] }
 0x1b8   :  { %361 = vmatpush.msrb.mxu2 %v298_v10  ;;  %479 = vmatpush.msra.mxu1 %v465_v45  ;;  %v446_v10 = vld [vmem:[#allocation2 + $0x483] ss:$0 sm:$0xff] }
 0x1b9   :  { %376 = vmatpush.msrb.mxu3 %v314_v5 }
 0x1ba   :  { %480 = vmatpush.msra.mxu1 %v464_v46 }
 0x1bb   :  { %377 = vmatpush.msrb.mxu3 %v311_v9 }
 0x1bc   :  { %481 = vmatpush.msra.mxu1 %v463_v50 }
 0x1bd   :  { %378 = vmatpush.msrb.mxu3 %v308_v11 }
 0x1be   :  { %482 = vmatpush.msra.mxu1 %v462_v53 }
 0x1bf   :  { %379 = vmatpush.msrb.mxu3 %v305_v13 }
 0x1c0   :  { %483 = vmatpush.msra.mxu1 %v461_v56 }
 0x1c1   :  { %380 = vmatpush.msrb.mxu3 %v302_v15  ;;  %v234_v15 = vperm.slane %v780_v43, 2 }
 0x1c2   :  { %484 = vmatpush.msra.mxu1 %v460_v57 }
 0x1c3   :  { %381 = vmatpush.msrb.mxu3 %v299_v18 }
 0x1c4   :  { %485 = vmatpush.msra.mxu1 %v459_v59 }
 0x1c6   :  { %486 = vmatpush.msra.mxu1 %v458_v62 }
 0x1c8   :  { %487 = vmatpush.msra.mxu1 %v457_v63 }
 0x1ca   :  { %488 = vmatpush.msra.mxu1 %v456_v1 }
 0x228   :  { %v139_v52 = vpop.f32.mrf.mxu1 }
 0x229   :  { %v142_v54 = vadd.f32 %v139_v52, %v766_v16  ;;  %v188_v16 = vld [vmem:[#allocation2 + $0x1b8] sm:$0xff] }
 0x22a   :  { %271 = vmatpush.msrb.mxu0 %v188_v16 }
 0x22b   :  { %176 = vmatmul.f32.vlgmr.msra.gmra.mxu2 %v142_v54 }
 0x22c   :  { %272 = vmatpush.msrb.mxu0 %v185_v2 }
 0x22e   :  { %273 = vmatpush.msrb.mxu0 %v182_v6 }
 0x230   :  { %386 = vmatpush.msra.mxu0 %v345_v14 }
 0x232   :  { %387 = vmatpush.msra.mxu0 %v342_v17 }
 0x233   :  { %362 = vmatmul.f32.vlgmr.msrb.gmra.mxu2 %v775_v12 }
 0x234   :  { %388 = vmatpush.msra.mxu0 %v339_v19 }
 0x236   :  { %389 = vmatpush.msra.mxu0 %v336_v20 }
 0x238   :  { %390 = vmatpush.msra.mxu0 %v333_v21 }
 0x23a   :  { %391 = vmatpush.msra.mxu0 %v330_v22 }
 0x23c   :  { %392 = vmatpush.msra.mxu0 %v327_v23 }
 0x23e   :  { %393 = vmatpush.msra.mxu0 %v324_v24 }
 0x240   :  { %394 = vmatpush.msra.mxu0 %v321_v25 }
 0x242   :  { %395 = vmatpush.msra.mxu0 %v318_v26 }
 0x244   :  { %396 = vmatpush.msra.mxu0 %v315_v27 }
 0x246   :  { %397 = vmatpush.msra.mxu0 %v312_v28 }
 0x248   :  { %398 = vmatpush.msra.mxu0 %v309_v30 }
 0x24a   :  { %399 = vmatpush.msra.mxu0 %v306_v33 }
 0x24c   :  { %400 = vmatpush.msra.mxu0 %v303_v35 }
 0x24e   :  { %401 = vmatpush.msra.mxu0 %v300_v36 }
 0x2ae   :  { %v177_v31 = vpop.f32.mrf.mxu2 }
 0x2af   :  { %v178_v32 = vadd.f32 %v177_v31, %v159_v29 }
 0x2b1   :  { %v180_v34 = vmax.f32 %v178_v32, 0.0 }
 0x2b3   :  { %254 = vmatmul.f32.vlgmr.msra.gmra.mxu3 %v180_v34  ;;  %274 = vmatmul.f32.vlgmr.msrb.gmra.mxu0 %v180_v34 }
 0x2b4   :  { %294 = vmatmul.f32.vlgmr.msrb.gmra.mxu1 %v180_v34 }
 0x2b6   :  { %v363_v48 = vpop.f32.mrf.mxu2 }
 0x2bb   :  { %382 = vmatmul.f32.vlgmr.msrb.gmra.mxu3 %v775_v12  ;;  %402 = vmatmul.f32.vlgmr.msra.gmra.mxu0 %v775_v12 }
 0x330   :  { %v275_v54 = vpop.f32.mrf.mxu0 }
 0x331   :  { %v276_v58 = vadd.f32 %v275_v54, %v233_v51  ;;  %v295_v17 = vpop.f32.mrf.mxu1 }
 0x332   :  { %v296_v24 = vadd.f32 %v295_v17, %v234_v15 }
 0x336   :  { %v255_v47 = vpop.f32.mrf.mxu3 }
 0x337   :  { %v256_v49 = vadd.f32 %v255_v47, %v232_v44 }
 0x338   :  { %v403_v8 = vpop.f32.mrf.mxu0 }
 0x339   :  { %v406_v52 = vadd.f32 %v363_v48, %v256_v49  ;;  %v447_v20 = vadd.f32 %v446_v10, %v403_v8 }
 0x33b   :  { %v556_v55 = vmul.f32 -1.442695, %v406_v52 }
 0x33d   :  { %571 = vpow2.f32 %v556_v55 }
 0x33e   :  { %v383_v60 = vpop.f32.mrf.mxu3 }
 0x33f   :  { %v426_v61 = vadd.f32 %v383_v60, %v276_v58 }
 0x341   :  { %v557_v16 = vmul.f32 -1.442695, %v426_v61 }
 0x343   :  { %v572_v0 = vpop.eup %571  ;;  %573 = vpow2.f32 %v557_v16 }
 0x344   :  { %v410_v2 = vadd.f32 1.0, %v572_v0 }
 0x346   :  { %575 = vrcp.f32 %v410_v2  ;;  %v422_v9 = vand.u32 2147483648, %v410_v2  ;;  %v420_v13 = vand.u32 2147483647, %v410_v2  ;;  %vm416_vm2 = vweird.f32 %v410_v2 }
 0x348   :  { %v423_v21 = vor.u32 1.1754944e-38, %v422_v9  ;;  %vm421_vm4 = vcmp.eq.f32.partialorder %v420_v13, 8.507059e+37 }
 0x349   :  { %v574_v3 = vpop.eup %573 }
 0x34a   :  { %v430_v4 = vadd.f32 1.0, %v574_v3 }
 0x34c   :  { %v576_v5 = vpop.eup %575  ;;  %577 = vrcp.f32 %v430_v4  ;;  %v442_v28 = vand.u32 2147483648, %v430_v4  ;;  %v440_v29 = vand.u32 2147483647, %v430_v4  ;;  %vm436_vm6 = vweird.f32 %v430_v4 }
 0x34d   :  { %v412_v6 = vmul.f32 %v576_v5, %v410_v2  ;;  %vm417_vm1 = vweird.f32 %v576_v5 }
 0x34e   :  { %vm418_vm3 = vmor %vm416_vm2, %vm417_vm1  ;;  %v443_v33 = vor.u32 1.1754944e-38, %v442_v28  ;;  %vm441_vm8 = vcmp.eq.f32.partialorder %v440_v29, 8.507059e+37 }
 0x34f   :  { %v413_v7 = vsub.f32 1.0, %v412_v6 }
 0x351   :  { %v414_v11 = vmul.f32 %v576_v5, %v413_v7 }
 0x352   :  { %v578_v14 = vpop.eup %577 }
 0x353   :  { %v432_v18 = vmul.f32 %v578_v14, %v430_v4  ;;  %v415_v19 = vadd.f32 %v576_v5, %v414_v11  ;;  %vm437_vm5 = vweird.f32 %v578_v14 }
 0x354   :  { %vm438_vm7 = vmor %vm436_vm6, %vm437_vm5 }
 0x355   :  { %v433_v22 = vsub.f32 1.0, %v432_v18  ;;  %v419_v23 = vsel %vm418_vm3, %v576_v5, %v415_v19 }
 0x356   :  { %v424_v25 = vsel %vm421_vm4, %v423_v21, %v419_v23 }
 0x357   :  { %v434_v26 = vmul.f32 %v578_v14, %v433_v22  ;;  %v448_v27 = vmul.f32 %v447_v20, %v424_v25 }
 0x359   :  { %v449_v30 = vadd.f32 %v448_v27, %v296_v24  ;;  %v435_v31 = vadd.f32 %v578_v14, %v434_v26 }
 0x35b   :  { %579 = vtanh.f32 %v449_v30  ;;  %v439_v32 = vsel %vm438_vm7, %v578_v14, %v435_v31 }
 0x35c   :  { %v444_v34 = vsel %vm441_vm8, %v443_v33, %v439_v32 }
 0x35d   :  { %v451_v35 = vsub.f32 1.0, %v444_v34  ;;  %v453_v38 = vmul.f32 %v444_v34, %v775_v12 }
 0x361   :  { %v580_v36 = vpop.eup %579 }
 0x362   :  { %v452_v37 = vmul.f32 %v580_v36, %v451_v35 }
 0x364   :  { %v454_v39 = vadd.f32 %v453_v38, %v452_v37 }
 0x366   :  { %489 = vmatmul.f32.vlgmr.msra.gmra.mxu1 %v454_v39  ;;  %455 = vst [vmem:[#allocation8] sm:$0x1] %v454_v39 }
 0x367   :  { %528 = dma.vmem_to_hbm [thread:$0]  %s524_s15, 16, %s526_s13, [#allocation9]  }
 0x368   :  { %539 = dma.vmem_to_hbm [thread:$0]  %s535_s17, 16, %s537_s20, [#allocation9]  }
 0x3e3   :  { %v490_v41 = vpop.f32.mrf.mxu1 }
 0x3e4   :  { %v491_v42 = vadd.f32 %v490_v41, %v472_v40 }
 0x3e6   :  { %v493_v43 = vsel %vm93_vm0, %v491_v42, -inf }
 0x3e7   :  { %494 = vmax.xlane.f32.xlu1 %v493_v43 }
 0x45a   :  { %v495_v44 = vpop.xlane.xlu1 %494 }
 0x45b   :  { %v496_v45 = vsub.f32 %v491_v42, %v495_v44 }
 0x45d   :  { %v497_v46 = vmul.f32 1.442695, %v496_v45 }
 0x45f   :  { %581 = vpow2.f32 %v497_v46 }
 0x465   :  { %v582_v47 = vpop.eup %581 }
 0x466   :  { %v499_v12 = vsel %vm93_vm0, %v582_v47, 0.0 }
 0x467   :  { %500 = vadd.xlane.f32.xlu1 %v499_v12 }
 0x4da   :  { %v501_v48 = vpop.xlane.xlu1 %500 }
 0x4db   :  { %583 = vlog2.f32 %v501_v48 }
 0x4e1   :  { %v584_v49 = vpop.eup %583 }
 0x4e2   :  { %v503_v50 = vmul.f32 0.6931472, %v584_v49 }
 0x4e4   :  { %v504_v51 = vadd.f32 %v503_v50, %v495_v44 }
 0x4e6   :  { %v505_v52 = vsub.f32 %v491_v42, %v504_v51 }
 0x4e8   :  { %506 = vst [vmem:[#allocation7] sm:$0x1] %v505_v52 }
 0x4e9   :  { %517 = dma.vmem_to_hbm [thread:$0]  %s513_s21, 16, %s515_s24, [#allocation4]  }
 0x4ea   :  { %709 = dma.done.wait [#allocation4], 16  }
 0x4eb   :  { %710 = vsyncadd [#allocation4], 4294967280 }
 0x4ec   :  { %711 = dma.done.wait [#allocation9], 32  }
 0x4ed   :  { %712 = vsyncadd [#allocation9], 4294967264 }
 0x4ee   :  { %552 = vsyncpa [#allocation3], 1 }
 0x4ef   :  { %553 = vsyncpa [#allocation6], 1 }
 0x4f0   :  { %554 = vsyncpa [#allocation4], 1 }
 0x4f1   :  { %555 = vsyncpa [#allocation9], 1 }

</bundles_post_ra>
